<compile_context>
chip_gen: v5e
topology: v5e:2x2
jax: 0.10.0
libtpu: 0.0.40
codegen_flags: <defaults>
</compile_context>

<pallas_src>
import jax
import jax.numpy as jnp
from jax import lax
from jax.experimental import pallas as pl
from jax.experimental.pallas import tpu as pltpu

_VMEM_BUDGET = 24 * 1024 * 1024      # per-step working set budget (under 32 MiB scoped limit)
_VMEM_LIMIT = 32 * 1024 * 1024       # safe default scoped VMEM on v5e/v6e/v7x
_MAX_BT = 8192                       # upper bound on batch tile rows


def _round8_up(x):
    return max(8, ((int(x) + 7) // 8) * 8)


def _disc_kernel(z_ref, w1_ref, b1_ref, w23_ref, b23_ref, o_ref):
    # Fused 2-matmul MLP hot path (Linear2+Linear3 pre-folded into W23/b23).
    z = z_ref[...].astype(jnp.bfloat16)                                   # in-kernel cast (VPU)
    h = jnp.dot(z, w1_ref[...], preferred_element_type=jnp.float32)      # MXU, f32 accumulate
    h = h + b1_ref[...]
    h = jnp.maximum(h, jnp.float32(0.01) * h)                             # LeakyReLU(0.01), VPU only
    h = h.astype(jnp.bfloat16)
    o = jnp.dot(h, w23_ref[...], preferred_element_type=jnp.float32)     # MXU, f32 accumulate
    o_ref[...] = (o + b23_ref[...]).astype(o_ref.dtype)                   # narrow (bt, out_dim) store


def _choose_batch_tile(B, latent, units, out_dim, requested=None):
    """Pick batch tile: multiple of 8, large enough to amortize ~0.35us/step overhead,
    small enough that the double-buffered working set stays under the VMEM budget,
    and capped so the grid has several tiles (megacore split on v7x)."""
    bt = requested if requested is not None else min(max(B, 8), _MAX_BT)
    bt = _round8_up(bt)

    def step_bytes(t):
        z_in = 2 * t * latent * 4                 # double-buffered f32 z tile
        out = 2 * t * out_dim * 4                 # double-buffered f32 output tile
        interm = t * units * 4 + t * units * 2 + t * out_dim * 4   # h f32 + h bf16 + o f32
        return z_in + out + interm

    while step_bytes(bt) > _VMEM_BUDGET and bt > 8:
        bt = _round8_up(bt // 2)

    if requested is None:
        # megacore-aware: aim for >=4 grid tiles (2 TCs on v7x), but never below 128 rows.
        cap = max(128, _round8_up(-(-B // 4)))
        bt = min(bt, cap)
    return bt


def prepare_discriminator_params(disc_params):
    """One-time host-side prep (hoist out of the per-call path):
    fold Linear2/Linear3 (no nonlinearity between them) and cast weights."""
    w1, b1, w2, b2, w3, b3 = disc_params
    w23 = jnp.dot(w2, w3, precision=lax.Precision.HIGHEST)                # (units, out_dim)
    b23 = jnp.dot(b2, w3, precision=lax.Precision.HIGHEST) + b3           # (1, out_dim)
    return (w1.astype(jnp.bfloat16),
            jnp.reshape(b1, (1, -1)).astype(jnp.float32),
            w23.astype(jnp.bfloat16),
            jnp.reshape(b23, (1, -1)).astype(jnp.float32))


def discriminator_forward(z, disc_params, labels=None, task_id=None, *,
                          prepared=None, batch_tile=None, min_pallas_batch=1024):
    """Forward of Discriminator.dis(z). `labels` / `task_id` are unused in the PyTorch
    forward and are accepted only for signature parity. GradientReversal is identity
    in forward.
    TODO(synk): gradient reversal (-lambda * grad) needs a jax.custom_vjp wrapper; not
    part of this forward kernel."""
    B, latent = z.shape

    if B < min_pallas_batch:
        # Tiny-batch fast path: XLA fusion of two small matmuls beats pallas_call
        # launch + padding + slicing. Pure f32, bit-faithful to the module.
        w1, b1, w2, b2, w3, b3 = disc_params
        h = z @ w1 + jnp.reshape(b1, (1, -1))
        h = jnp.where(h >= 0, h, 0.01 * h)
        h = h @ w2 + jnp.reshape(b2, (1, -1))
        return h @ w3 + jnp.reshape(b3, (1, -1))

    if prepared is None:
        prepared = prepare_discriminator_params(disc_params)
    w1_bf, b1_f, w23_bf, b23_f = prepared
    units = w1_bf.shape[1]
    out_dim = w23_bf.shape[1]

    bt = _choose_batch_tile(B, latent, units, out_dim, batch_tile)
    B_pad = ((B + bt - 1) // bt) * bt
    z_p = z if B_pad == B else jnp.pad(z, ((0, B_pad - B), (0, 0)))

    grid = (B_pad // bt,)
    out = pl.pallas_call(
        _disc_kernel,
        out_shape=jax.ShapeDtypeStruct((B_pad, out_dim), jnp.float32),
        grid_spec=pltpu.PrefetchScalarGridSpec(
            num_scalar_prefetch=0,
            grid=grid,
            in_specs=[
                pl.BlockSpec((bt, latent), lambda i: (i, 0)),         # z tile (streamed, f32)
                pl.BlockSpec((latent, units), lambda i: (0, 0)),      # W1 (resident, bf16)
                pl.BlockSpec((1, units), lambda i: (0, 0)),           # b1 (resident, f32)
                pl.BlockSpec((units, out_dim), lambda i: (0, 0)),     # folded W23 (resident, bf16)
                pl.BlockSpec((1, out_dim), lambda i: (0, 0)),         # folded b23 (resident, f32)
            ],
            out_specs=pl.BlockSpec((bt, out_dim), lambda i: (i, 0)),  # narrow, un-padded columns
        ),
        compiler_params=pltpu.CompilerParams(
            dimension_semantics=("parallel",),     # batch tiles split across TCs on v7x
            vmem_limit_bytes=_VMEM_LIMIT,
        ),
    )(z_p, w1_bf, b1_f, w23_bf, b23_f)

    return out if B_pad == B else out[:B]


def init_discriminator_params(key, latent_dim, units, out_dim):
    """Deterministic init mimicking torch.nn.Linear default: U(-1/sqrt(fan_in), 1/sqrt(fan_in))."""
    ks = jax.random.split(key, 6)

    def lin(kw, kb, fan_in, fan_out):
        bound = 1.0 / jnp.sqrt(jnp.float32(fan_in))
        w = jax.random.uniform(kw, (fan_in, fan_out), jnp.float32, -bound, bound)
        b = jax.random.uniform(kb, (1, fan_out), jnp.float32, -bound, bound)
        return w, b

    w1, b1 = lin(ks[0], ks[1], latent_dim, units)
    w2, b2 = lin(ks[2], ks[3], units, units)
    w3, b3 = lin(ks[4], ks[5], units, out_dim)
    return (w1, b1, w2, b2, w3, b3)


def _reference_forward(z, disc_params):
    # Pure-JAX f32 reference of the original (unfused) module forward.
    w1, b1, w2, b2, w3, b3 = disc_params
    h = z @ w1 + b1
    h = jnp.where(h >= 0, h, 0.01 * h)
    h = h @ w2 + b2
    return h @ w3 + b3


if __name__ == "__main__":
    # Module config (matches Discriminator.__init__ semantics)
    params = {"ntasks": 5, "num_shared_features": 32}
    task_id = 2
    units = 64
    latent_dim = params["num_shared_features"]
    out_dim = task_id + 2  # Linear(units, task_id + 2)

    key = jax.random.PRNGKey(0)
    k_z1, k_z2, k_p = jax.random.split(key, 3)
    disc_params = init_discriminator_params(k_p, latent_dim, units, out_dim)
    prepared = prepare_discriminator_params(disc_params)   # hoisted one-time fold/cast

    # --- 1) tiny batch: plain-jnp fast path (matches module exactly) ---
    B_small = 8
    z_small = jax.random.normal(k_z1, (B_small, latent_dim), jnp.float32)
    labels = jnp.zeros((B_small,), jnp.int32)               # unused in forward (signature parity)
    out_small = jax.block_until_ready(
        discriminator_forward(z_small, disc_params, labels, task_id))
    ref_small = _reference_forward(z_small, disc_params)
    assert out_small.shape == (B_small, out_dim)
    assert jnp.allclose(out_small, ref_small, atol=1e-4, rtol=1e-4), "fast-path mismatch"

    # --- 2) Pallas kernel path (forced, small-but-tiled batch) ---
    B = 512
    z = jax.random.normal(k_z2, (B, latent_dim), jnp.float32)
    out = jax.block_until_ready(
        discriminator_forward(z, disc_params, None, task_id,
                              prepared=prepared, min_pallas_batch=0))
    ref = _reference_forward(z, disc_params)
    assert out.shape == (B, out_dim)
    # bf16 MXU path + folded W23 -> loosened tolerance vs f32 reference.
    assert jnp.allclose(out, ref, atol=5e-2, rtol=5e-2), "Pallas output mismatch vs reference"

    print("KERNEL_OK")
</pallas_src>

<mosaic_0001>
module attributes {stable_mosaic.version = 11 : i64} {
  func.func @_disc_kernel(%arg0: i32, %arg1: memref<128x32xf32, #tpu.memory_space<vmem>>, %arg2: memref<32x64xbf16, #tpu.memory_space<vmem>>, %arg3: memref<1x64xf32, #tpu.memory_space<vmem>>, %arg4: memref<64x4xbf16, #tpu.memory_space<vmem>>, %arg5: memref<1x4xf32, #tpu.memory_space<vmem>>, %arg6: memref<128x4xf32, #tpu.memory_space<vmem>>) attributes {dimension_semantics = [#tpu.dimension_semantics<parallel>], iteration_bounds = array<i64: 4>, scalar_prefetch = 0 : i64, scratch_operands = 0 : i64, tpu.core_type = #tpu.core_type<tc>, window_params = [{transform_indices = @transform_0, window_bounds = array<i64: 128, 32>}, {pipeline_mode = #tpu.pipeline_mode<synchronous>, transform_indices = @transform_1, window_bounds = array<i64: 32, 64>}, {pipeline_mode = #tpu.pipeline_mode<synchronous>, transform_indices = @transform_2, window_bounds = array<i64: 1, 64>}, {pipeline_mode = #tpu.pipeline_mode<synchronous>, transform_indices = @transform_3, window_bounds = array<i64: 64, 4>}, {pipeline_mode = #tpu.pipeline_mode<synchronous>, transform_indices = @transform_4, window_bounds = array<i64: 1, 4>}, {transform_indices = @transform_5, window_bounds = array<i64: 128, 4>}]} {
    %c0 = arith.constant 0 : index
    %c0_0 = arith.constant 0 : index
    %0 = vector.load %arg1[%c0, %c0_0] : memref<128x32xf32, #tpu.memory_space<vmem>>, vector<128x32xf32>
    %1 = arith.truncf %0 : vector<128x32xf32> to vector<128x32xbf16>
    %c0_1 = arith.constant 0 : index
    %c0_2 = arith.constant 0 : index
    %2 = vector.load %arg2[%c0_1, %c0_2] : memref<32x64xbf16, #tpu.memory_space<vmem>>, vector<32x64xbf16>
    %cst = arith.constant dense<0.000000e+00> : vector<128x64xf32>
    %3 = tpu.matmul %1, %2, %cst {dimension_numbers = #tpu.dot_dimension_numbers<[1], [0], [0], [1], [0, 0, 1, 1], [], []>} : vector<128x32xbf16>, vector<32x64xbf16>, vector<128x64xf32> -> vector<128x64xf32>
    %c0_3 = arith.constant 0 : index
    %c0_4 = arith.constant 0 : index
    %4 = vector.load %arg3[%c0_3, %c0_4] : memref<1x64xf32, #tpu.memory_space<vmem>>, vector<1x64xf32>
    %5 = vector.broadcast %4 : vector<1x64xf32> to vector<128x64xf32>
    %6 = arith.addf %3, %5 : vector<128x64xf32>
    %cst_5 = arith.constant 0.00999999977 : f32
    %7 = vector.broadcast %cst_5 : f32 to vector<128x64xf32>
    %8 = arith.mulf %7, %6 : vector<128x64xf32>
    %9 = arith.maximumf %6, %8 : vector<128x64xf32>
    %10 = arith.truncf %9 : vector<128x64xf32> to vector<128x64xbf16>
    %c0_6 = arith.constant 0 : index
    %c0_7 = arith.constant 0 : index
    %11 = vector.load %arg4[%c0_6, %c0_7] : memref<64x4xbf16, #tpu.memory_space<vmem>>, vector<64x4xbf16>
    %cst_8 = arith.constant dense<0.000000e+00> : vector<128x4xf32>
    %12 = tpu.matmul %10, %11, %cst_8 {dimension_numbers = #tpu.dot_dimension_numbers<[1], [0], [0], [1], [0, 0, 1, 1], [], []>} : vector<128x64xbf16>, vector<64x4xbf16>, vector<128x4xf32> -> vector<128x4xf32>
    %c0_9 = arith.constant 0 : index
    %c0_10 = arith.constant 0 : index
    %13 = vector.load %arg5[%c0_9, %c0_10] : memref<1x4xf32, #tpu.memory_space<vmem>>, vector<1x4xf32>
    %14 = vector.broadcast %13 : vector<1x4xf32> to vector<128x4xf32>
    %15 = arith.addf %12, %14 : vector<128x4xf32>
    %c0_11 = arith.constant 0 : index
    %c0_12 = arith.constant 0 : index
    %16 = vector.load %arg6[%c0_11, %c0_12] : memref<128x4xf32, #tpu.memory_space<vmem>>, vector<128x4xf32>
    tpu.vector_store %arg6[%c0_11, %c0_12], %15 {strides = array<i32>} : memref<128x4xf32, #tpu.memory_space<vmem>>, vector<128x4xf32>,
    return
  }
  func.func @transform_0(%arg0: i32) -> (i32, i32) {
    %c0_i32 = arith.constant 0 : i32
    %c0_i32_0 = arith.constant 0 : i32
    return %arg0, %c0_i32 : i32, i32
  }
  func.func @transform_1(%arg0: i32) -> (i32, i32) {
    %c0_i32 = arith.constant 0 : i32
    %c0_i32_0 = arith.constant 0 : i32
    %c0_i32_1 = arith.constant 0 : i32
    return %c0_i32, %c0_i32_0 : i32, i32
  }
  func.func @transform_2(%arg0: i32) -> (i32, i32) {
    %c0_i32 = arith.constant 0 : i32
    %c0_i32_0 = arith.constant 0 : i32
    %c0_i32_1 = arith.constant 0 : i32
    return %c0_i32, %c0_i32_0 : i32, i32
  }
  func.func @transform_3(%arg0: i32) -> (i32, i32) {
    %c0_i32 = arith.constant 0 : i32
    %c0_i32_0 = arith.constant 0 : i32
    %c0_i32_1 = arith.constant 0 : i32
    return %c0_i32, %c0_i32_0 : i32, i32
  }
  func.func @transform_4(%arg0: i32) -> (i32, i32) {
    %c0_i32 = arith.constant 0 : i32
    %c0_i32_0 = arith.constant 0 : i32
    %c0_i32_1 = arith.constant 0 : i32
    return %c0_i32, %c0_i32_0 : i32, i32
  }
  func.func @transform_5(%arg0: i32) -> (i32, i32) {
    %c0_i32 = arith.constant 0 : i32
    %c0_i32_0 = arith.constant 0 : i32
    return %arg0, %c0_i32 : i32, i32
  }
}

</mosaic_0001>

<bundles_post_ra>
// kernel: tpu_custom_call.1
= control target key start
LH: loop header
LB: loop body
LE: loop exit
PB: predicated region body
PF: predicated region fallthrough
CT: control target
= control target key end

     0   :  { %s681_s18 = smov 0   ;;  %s797_s0 = inlined_call_operand.vmem [shape: f32[512,32], index: 0, kind: input, shape index: {}]   ;;  %s798_s1 = inlined_call_operand.vmem [shape: bf16[32,64], index: 1, kind: input, shape index: {}]   ;;  %s799_s2 = inlined_call_operand.vmem [shape: f32[1,64], index: 2, kind: input, shape index: {}]   ;;  %s800_s3 = inlined_call_operand.vmem [shape: bf16[64,4], index: 3, kind: input, shape index: {}]   ;;  %s801_s4 = inlined_call_operand.vmem [shape: f32[1,4], index: 4, kind: input, shape index: {}]   ;;  %s802_s5 = inlined_call_operand.vmem [shape: f32[512,4], index: 5, kind: output, shape index: {}]  }
   0x1 LB: > { %s570_s19 = sadd.s32 4294967295, %s649_s18   ;;  %p574_p0 = scmp.ge.s32.totalorder %s649_s18, 1  ;;  %s649_s18 = sphi %s681_s18, %s15_s18  }
   0x2   : > { %p188_p1 = scmp.lt.s32.totalorder %s649_s18, 5 }
   0x4   : > { %p189_p2 = pnand %p574_p0, %p188_p1 }
   0x5   : > { %s575_s22 = sshll.u32 (!%p189_p2), %s570_s19, 4 }
   0x6   : > { %192 = sbr.rel (%p189_p2) target bundleno = 416 (0x1a0), region = 40  ;;  %p217_p3 = scmp.lt.s32.totalorder (!%p189_p2), %s575_s22, 63 }
   0xb   : > { %v622_v0 = vld [vmem:[%s798_s1 + $0x8] sm:$0xff]  ;;  %v621_v1 = vld [vmem:[%s798_s1] sm:$0xff]  ;;  %s804_s22 = smov (!%p217_p3, %s575_s22), 63  ;;  %vm273_vm0 = vcmask 261120   ;;  %v626_v26 = vld [vmem:[%s800_s3 + $0x18] sm:$0xff]  ;;  %vm423_vm1 = vcmask 523264  }
   0xc   : > { %304 = vmatpush.bf16.msra.mxu0 %v622_v0  ;;  %627 = vmatpush.bf16.msra.mxu3 %v622_v0  ;;  %s576_s25 = sshll.u32 %s804_s22, 3  ;;  %v625_v27 = vld [vmem:[%s800_s3 + $0x10] sm:$0xff]  ;;  %v624_v28 = vld [vmem:[%s800_s3 + $0x8] sm:$0xff]  ;;  %v623_v29 = vld [vmem:[%s800_s3] sm:$0xff]  ;;  %vm497_vm2 = vcmask 31744  }
   0xd   : > { %s220_s28 = scalar_lea.vmem %s797_s0, %s576_s25  ;;  %452 = vmatpush.bf16.msra.mxu1 %v626_v26  ;;  %629 = vmatpush.bf16.msra.mxu2 %v626_v26  ;;  %v726_v31 = vld [vmem:[%s799_s2] ss:$0 sm:$0xff]  ;;  %s760_s19 = scalar_lea.vmem %s802_s5, %s576_s25 }
   0xe   : > { %v229_v2 = vld [vmem:[%s220_s28] sm:$0xff]  ;;  %v230_v3 = vld [vmem:[%s220_s28 + $0x8] sm:$0xff]  ;;  %v231_v5 = vld [vmem:[%s220_s28 + $0x10] sm:$0xff] }
   0xf   : > { %v245_v4 = vpack.c.bf16 %v230_v3, %v229_v2  ;;  %v232_v6 = vld [vmem:[%s220_s28 + $0x18] sm:$0xff]  ;;  %v233_v8 = vld [vmem:[%s220_s28 + $0x20] sm:$0xff]  ;;  %v234_v9 = vld [vmem:[%s220_s28 + $0x28] sm:$0xff] }
  0x10   : > { %305 = vmatpush.bf16.msra.mxu0 %v621_v1  ;;  %628 = vmatpush.bf16.msra.mxu3 %v621_v1  ;;  %v246_v7 = vpack.c.bf16 %v232_v6, %v231_v5  ;;  %v247_v10 = vpack.c.bf16 %v234_v9, %v233_v8  ;;  %v239_v11 = vld [vmem:[%s220_s28 + $0x50] sm:$0xff]  ;;  %v240_v12 = vld [vmem:[%s220_s28 + $0x58] sm:$0xff]  ;;  %v241_v16 = vld [vmem:[%s220_s28 + $0x60] sm:$0xff] }
  0x11   : > { %v250_v13 = vpack.c.bf16 %v240_v12, %v239_v11  ;;  %v235_v14 = vld [vmem:[%s220_s28 + $0x30] sm:$0xff]  ;;  %v236_v15 = vld [vmem:[%s220_s28 + $0x38] sm:$0xff]  ;;  %v242_v17 = vld [vmem:[%s220_s28 + $0x68] sm:$0xff]  ;;  %453 = vmatpush.bf16.msra.mxu1 %v625_v27  ;;  %630 = vmatpush.bf16.msra.mxu2 %v625_v27 }
  0x12   : > { %v248_v18 = vpack.c.bf16 %v236_v15, %v235_v14  ;;  %v251_v19 = vpack.c.bf16 %v242_v17, %v241_v16  ;;  %v237_v20 = vld [vmem:[%s220_s28 + $0x40] sm:$0xff]  ;;  %v238_v21 = vld [vmem:[%s220_s28 + $0x48] sm:$0xff]  ;;  %v243_v22 = vld [vmem:[%s220_s28 + $0x70] sm:$0xff] }
  0x13   : > { %587 = vmatmul.msk.bf16.vlgmr.msra.gmra.mxu0 %vm273_vm0, %v245_v4  ;;  %592 = vmatmul.msk.bf16.vlgmr.msra.gmra.mxu3 %vm273_vm0, %v250_v13  ;;  %v244_v23 = vld [vmem:[%s220_s28 + $0x78] sm:$0xff]  ;;  %v249_v24 = vpack.c.bf16 %v238_v21, %v237_v20 }
  0x14   : > { %v252_v25 = vpack.c.bf16 %v244_v23, %v243_v22 }
  0x15   : > { %454 = vmatpush.bf16.msra.mxu1 %v624_v28  ;;  %631 = vmatpush.bf16.msra.mxu2 %v624_v28 }
  0x19   : > { %455 = vmatpush.bf16.msra.mxu1 %v623_v29  ;;  %632 = vmatpush.bf16.msra.mxu2 %v623_v29 }
  0x23   : > { %588 = vmatmul.msk.bf16.gmra.mxu0 %vm273_vm0, %v246_v7  ;;  %593 = vmatmul.msk.bf16.gmra.mxu3 %vm273_vm0, %v251_v19 }
  0x33   : > { %589 = vmatmul.msk.bf16.gmra.mxu0 %vm273_vm0, %v247_v10  ;;  %594 = vmatmul.msk.bf16.gmra.mxu3 %vm273_vm0, %v252_v25 }
  0x43   : > { %590 = vmatmul.msk.bf16.gmra.mxu0 %vm273_vm0, %v248_v18 }
  0x53   : > { %591 = vmatmul.msk.bf16.gmra.mxu0 %vm273_vm0, %v249_v24 }
  0x90   : > { %v307_v30 = vpop.f32.mrf.mxu0 }
  0x91   : > { %v308_v32 = vadd.f32 %v726_v31, %v307_v30 }
  0x93   : > { %v347_v34 = vmul.f32 0.01, %v308_v32 }
  0x95   : > { %v363_v37 = vmax.f32 %v308_v32, %v347_v34 }
  0x96   : > { %v332_v2 = vpop.f32.mrf.mxu3 }
  0x97   : > { %v333_v15 = vadd.f32 %v726_v31, %v332_v2 }
  0x98   : > { %v309_v33 = vpop.f32.mrf.mxu0 }
  0x99   : > { %v310_v35 = vadd.f32 %v726_v31, %v309_v33  ;;  %v357_v17 = vmul.f32 0.01, %v333_v15 }
  0x9b   : > { %v348_v36 = vmul.f32 0.01, %v310_v35  ;;  %v373_v19 = vmax.f32 %v333_v15, %v357_v17 }
  0x9d   : > { %v364_v38 = vmax.f32 %v310_v35, %v348_v36 }
  0x9e   : > { %v334_v7 = vpop.f32.mrf.mxu3 }
  0x9f   : > { %v379_v39 = vpack.c.bf16 %v364_v38, %v363_v37  ;;  %v335_v16 = vadd.f32 %v726_v31, %v334_v7 }
  0xa0   : > { %v312_v40 = vpop.f32.mrf.mxu0 }
  0xa1   : > { %611 = vmatmul.msk.bf16.vlgmr.msra.gmra.mxu1 %vm423_vm1, %v379_v39  ;;  %v313_v41 = vadd.f32 %v726_v31, %v312_v40  ;;  %v358_v18 = vmul.f32 0.01, %v335_v16  ;;  %v642_v40 = vld [vmem:[%s801_s4] ss:$0 sm:$0xff] }
  0xa3   : > { %v349_v43 = vmul.f32 0.01, %v313_v41  ;;  %v374_v20 = vmax.f32 %v335_v16, %v358_v18 }
  0xa5   : > { %v365_v46 = vmax.f32 %v313_v41, %v349_v43  ;;  %v384_v22 = vpack.c.bf16 %v374_v20, %v373_v19 }
  0xa6   : > { %v337_v14 = vpop.f32.mrf.mxu3 }
  0xa7   : > { %v338_v23 = vadd.f32 %v726_v31, %v337_v14 }
  0xa8   : > { %v314_v42 = vpop.f32.mrf.mxu0 }
  0xa9   : > { %v315_v44 = vadd.f32 %v726_v31, %v314_v42  ;;  %v359_v26 = vmul.f32 0.01, %v338_v23 }
  0xab   : > { %v350_v45 = vmul.f32 0.01, %v315_v44  ;;  %v375_v28 = vmax.f32 %v338_v23, %v359_v26 }
  0xad   : > { %v366_v47 = vmax.f32 %v315_v44, %v350_v45 }
  0xae   : > { %v339_v21 = vpop.f32.mrf.mxu3 }
  0xaf   : > { %v380_v48 = vpack.c.bf16 %v366_v47, %v365_v46  ;;  %v340_v24 = vadd.f32 %v726_v31, %v339_v21 }
  0xb0   : > { %v317_v49 = vpop.f32.mrf.mxu0 }
  0xb1   : > { %612 = vmatmul.msk.bf16.gmra.mxu1 %vm423_vm1, %v380_v48  ;;  %v318_v50 = vadd.f32 %v726_v31, %v317_v49  ;;  %v360_v27 = vmul.f32 0.01, %v340_v24 }
  0xb3   : > { %v351_v52 = vmul.f32 0.01, %v318_v50  ;;  %v376_v29 = vmax.f32 %v340_v24, %v360_v27 }
  0xb5   : > { %v367_v55 = vmax.f32 %v318_v50, %v351_v52  ;;  %v385_v30 = vpack.c.bf16 %v376_v29, %v375_v28 }
  0xb6   : > { %v342_v25 = vpop.f32.mrf.mxu3 }
  0xb7   : > { %v343_v33 = vadd.f32 %v726_v31, %v342_v25 }
  0xb8   : > { %v319_v51 = vpop.f32.mrf.mxu0 }
  0xb9   : > { %v320_v53 = vadd.f32 %v726_v31, %v319_v51  ;;  %v361_v35 = vmul.f32 0.01, %v343_v33 }
  0xbb   : > { %v352_v54 = vmul.f32 0.01, %v320_v53  ;;  %v377_v37 = vmax.f32 %v343_v33, %v361_v35 }
  0xbd   : > { %v368_v56 = vmax.f32 %v320_v53, %v352_v54 }
  0xbe   : > { %v344_v32 = vpop.f32.mrf.mxu3 }
  0xbf   : > { %v381_v57 = vpack.c.bf16 %v368_v56, %v367_v55  ;;  %v345_v34 = vadd.f32 %v726_v31, %v344_v32 }
  0xc0   : > { %v322_v58 = vpop.f32.mrf.mxu0 }
  0xc1   : > { %613 = vmatmul.msk.bf16.gmra.mxu1 %vm423_vm1, %v381_v57  ;;  %v323_v59 = vadd.f32 %v726_v31, %v322_v58  ;;  %v362_v36 = vmul.f32 0.01, %v345_v34 }
  0xc3   : > { %v353_v61 = vmul.f32 0.01, %v323_v59  ;;  %v378_v38 = vmax.f32 %v345_v34, %v362_v36 }
  0xc5   : > { %v369_v0 = vmax.f32 %v323_v59, %v353_v61  ;;  %v386_v39 = vpack.c.bf16 %v378_v38, %v377_v37 }
  0xc8   : > { %v324_v60 = vpop.f32.mrf.mxu0 }
  0xc9   : > { %v325_v62 = vadd.f32 %v726_v31, %v324_v60 }
  0xcb   : > { %v354_v63 = vmul.f32 0.01, %v325_v62 }
  0xcd   : > { %v370_v1 = vmax.f32 %v325_v62, %v354_v63 }
  0xcf   : > { %v382_v3 = vpack.c.bf16 %v370_v1, %v369_v0 }
  0xd0   : > { %v327_v4 = vpop.f32.mrf.mxu0 }
  0xd1   : > { %614 = vmatmul.msk.bf16.gmra.mxu1 %vm423_vm1, %v382_v3  ;;  %v328_v5 = vadd.f32 %v726_v31, %v327_v4 }
  0xd3   : > { %v355_v8 = vmul.f32 0.01, %v328_v5 }
  0xd5   : > { %v371_v11 = vmax.f32 %v328_v5, %v355_v8 }
  0xd8   : > { %v329_v6 = vpop.f32.mrf.mxu0 }
  0xd9   : > { %v330_v9 = vadd.f32 %v726_v31, %v329_v6 }
  0xdb   : > { %v356_v10 = vmul.f32 0.01, %v330_v9 }
  0xdd   : > { %v372_v12 = vmax.f32 %v330_v9, %v356_v10 }
  0xdf   : > { %v383_v13 = vpack.c.bf16 %v372_v12, %v371_v11 }
  0xe1   : > { %615 = vmatmul.msk.bf16.vlgmr.msra.gmra.mxu2 %vm423_vm1, %v383_v13 }
  0xf1   : > { %616 = vmatmul.msk.bf16.gmra.mxu2 %vm423_vm1, %v384_v22 }
 0x101   : > { %617 = vmatmul.msk.bf16.gmra.mxu2 %vm423_vm1, %v385_v30 }
 0x111   : > { %618 = vmatmul.msk.bf16.gmra.mxu2 %vm423_vm1, %v386_v39 }
 0x11e   : > { %v457_v31 = vpop.f32.mrf.mxu1 }
 0x11f   : > { %v458_v41 = vadd.f32 %v642_v40, %v457_v31 }
 0x121   : > { %498 = vst.msk [vmem:[%s760_s19] sm:$0xff] %vm497_vm2, %v458_v41 }
 0x126   : > { %v459_v42 = vpop.f32.mrf.mxu1 }
 0x127   : > { %v460_v43 = vadd.f32 %v642_v40, %v459_v42 }
 0x129   : > { %499 = vst.msk [vmem:[%s760_s19 + $0x8] sm:$0xff] %vm497_vm2, %v460_v43 }
 0x12e   : > { %v462_v44 = vpop.f32.mrf.mxu1 }
 0x12f   : > { %v463_v45 = vadd.f32 %v642_v40, %v462_v44 }
 0x131   : > { %500 = vst.msk [vmem:[%s760_s19 + $0x10] sm:$0xff] %vm497_vm2, %v463_v45 }
 0x136   : > { %v464_v46 = vpop.f32.mrf.mxu1 }
 0x137   : > { %v465_v47 = vadd.f32 %v642_v40, %v464_v46 }
 0x139   : > { %501 = vst.msk [vmem:[%s760_s19 + $0x18] sm:$0xff] %vm497_vm2, %v465_v47 }
 0x13e   : > { %v467_v48 = vpop.f32.mrf.mxu1 }
 0x13f   : > { %v468_v49 = vadd.f32 %v642_v40, %v467_v48 }
 0x141   : > { %502 = vst.msk [vmem:[%s760_s19 + $0x20] sm:$0xff] %vm497_vm2, %v468_v49 }
 0x146   : > { %v469_v50 = vpop.f32.mrf.mxu1 }
 0x147   : > { %v470_v51 = vadd.f32 %v642_v40, %v469_v50 }
 0x149   : > { %503 = vst.msk [vmem:[%s760_s19 + $0x28] sm:$0xff] %vm497_vm2, %v470_v51 }
 0x14e   : > { %v472_v52 = vpop.f32.mrf.mxu1 }
 0x14f   : > { %v473_v53 = vadd.f32 %v642_v40, %v472_v52 }
 0x151   : > { %504 = vst.msk [vmem:[%s760_s19 + $0x30] sm:$0xff] %vm497_vm2, %v473_v53 }
 0x156   : > { %v474_v54 = vpop.f32.mrf.mxu1 }
 0x157   : > { %v475_v55 = vadd.f32 %v642_v40, %v474_v54 }
 0x159   : > { %505 = vst.msk [vmem:[%s760_s19 + $0x38] sm:$0xff] %vm497_vm2, %v475_v55 }
 0x164   : > { %v477_v56 = vpop.f32.mrf.mxu2 }
 0x165   : > { %v478_v57 = vadd.f32 %v642_v40, %v477_v56 }
 0x167   : > { %506 = vst.msk [vmem:[%s760_s19 + $0x40] sm:$0xff] %vm497_vm2, %v478_v57 }
 0x16c   : > { %v479_v58 = vpop.f32.mrf.mxu2 }
 0x16d   : > { %v480_v59 = vadd.f32 %v642_v40, %v479_v58 }
 0x16f   : > { %507 = vst.msk [vmem:[%s760_s19 + $0x48] sm:$0xff] %vm497_vm2, %v480_v59 }
 0x174   : > { %v482_v60 = vpop.f32.mrf.mxu2 }
 0x175   : > { %v483_v61 = vadd.f32 %v642_v40, %v482_v60 }
 0x177   : > { %508 = vst.msk [vmem:[%s760_s19 + $0x50] sm:$0xff] %vm497_vm2, %v483_v61 }
 0x17c   : > { %v484_v62 = vpop.f32.mrf.mxu2 }
 0x17d   : > { %v485_v63 = vadd.f32 %v642_v40, %v484_v62 }
 0x17f   : > { %509 = vst.msk [vmem:[%s760_s19 + $0x58] sm:$0xff] %vm497_vm2, %v485_v63 }
 0x184   : > { %v487_v0 = vpop.f32.mrf.mxu2 }
 0x185   : > { %v488_v1 = vadd.f32 %v642_v40, %v487_v0 }
 0x187   : > { %510 = vst.msk [vmem:[%s760_s19 + $0x60] sm:$0xff] %vm497_vm2, %v488_v1 }
 0x18c   : > { %v489_v2 = vpop.f32.mrf.mxu2 }
 0x18d   : > { %v490_v3 = vadd.f32 %v642_v40, %v489_v2 }
 0x18f   : > { %511 = vst.msk [vmem:[%s760_s19 + $0x68] sm:$0xff] %vm497_vm2, %v490_v3 }
 0x194   : > { %v492_v4 = vpop.f32.mrf.mxu2 }
 0x195   : > { %v493_v5 = vadd.f32 %v642_v40, %v492_v4 }
 0x197   : > { %512 = vst.msk [vmem:[%s760_s19 + $0x70] sm:$0xff] %vm497_vm2, %v493_v5 }
 0x19c   : > { %v494_v6 = vpop.f32.mrf.mxu2 }
 0x19d   : > { %v495_v7 = vadd.f32 %v642_v40, %v494_v6 }
 0x19f   : > { %513 = vst.msk [vmem:[%s760_s19 + $0x78] sm:$0xff] %vm497_vm2, %v495_v7 }
 0x1a0 PF: > { %s15_s18 = sadd.s32 1, %s649_s18  }
 0x1a1   : > { %p12_p4 = scmp.ge.s32.totalorder %s15_s18, 6  }
 0x1a3   :  { %14 = sbr.rel (!%p12_p4) target bundleno = 1 (0x1), region = 70 }

</bundles_post_ra>
